<compile_context>
chip_gen: v5e
topology: v5e:2x2
jax: 0.10.0
libtpu: 0.0.40
codegen_flags: <defaults>
</compile_context>

<pallas_src>
import math

import jax
import jax.numpy as jnp
from jax.experimental import pallas as pl
from jax.experimental.pallas import tpu as pltpu


def _mlp_kernel(x_ref,
                w1_ref, b1_ref,
                w2_ref, b2_ref,
                w3_ref, b3_ref,
                w4_ref, b4_ref,
                o_ref):
    """Feature-major 4-layer MLP.

    x_ref : (n_obs, tile)  bf16   -- batch rides the 128-lane axis
    wK_ref: (out_f, in_f)  bf16   -- transposed vs. the (in, out) math layout
    bK_ref: (out_f, 1)     f32
    o_ref : (n_out, tile)  f32
    """
    # layer 1: input
    h = jnp.dot(w1_ref[...], x_ref[...], preferred_element_type=jnp.float32)
    h = jnp.maximum(h + b1_ref[...], 0.0)
    # layer 2: hidden
    h = jnp.dot(w2_ref[...], h.astype(w2_ref.dtype),
                preferred_element_type=jnp.float32)
    h = jnp.maximum(h + b2_ref[...], 0.0)
    # layer 3: hidden_2
    h = jnp.dot(w3_ref[...], h.astype(w3_ref.dtype),
                preferred_element_type=jnp.float32)
    h = jnp.maximum(h + b3_ref[...], 0.0)
    # layer 4: output (+ final ReLU, as in the PyTorch forward)
    h = jnp.dot(w4_ref[...], h.astype(w4_ref.dtype),
                preferred_element_type=jnp.float32)
    o_ref[...] = jnp.maximum(h + b4_ref[...], 0.0).astype(o_ref.dtype)


def _round_up(n, m):
    return ((n + m - 1) // m) * m


def mlp_forward(x, params, *, batch_tile=4096):
    """x: (B, n_obs) float32.  params: w1..w4 (in,out) f32, b1..b4 (1,out) f32.

    Returns (B, n_out) float32, matching the PyTorch module's forward.
    """
    assert batch_tile % 128 == 0, "batch_tile must be a multiple of 128 lanes"
    B, n_obs = x.shape
    n_hidden = params["w1"].shape[1]
    n_out = params["w4"].shape[1]

    # ---- pick the batch tile (lane axis -> multiple of 128) -----------------
    # No forced multi-step split: on single-TC v5e/v6e the grid is a serial
    # loop, so one big tile is best; large batches give >=2 steps anyway, which
    # the "parallel" axis shards across v7x's two TensorCores.
    b_pad128 = _round_up(B, 128)
    n_steps = pl.cdiv(b_pad128, batch_tile)
    tile = _round_up(pl.cdiv(b_pad128, n_steps), 128)
    b_pad = tile * n_steps
    grid = (n_steps,)

    # ---- layout plumbing: ONE fused pad + transpose + bf16 cast over x ------
    xp = x if b_pad == B else jnp.pad(x, ((0, b_pad - B), (0, 0)))
    xt = xp.T.astype(jnp.bfloat16)                      # (n_obs, b_pad)

    # Weights transposed to (out, in) bf16; biases as (out, 1) f32 columns.
    w1 = params["w1"].T.astype(jnp.bfloat16)            # (n_hidden, n_obs)
    w2 = params["w2"].T.astype(jnp.bfloat16)            # (n_hidden, n_hidden)
    w3 = params["w3"].T.astype(jnp.bfloat16)            # (n_hidden, n_hidden)
    w4 = params["w4"].T.astype(jnp.bfloat16)            # (n_out,    n_hidden)
    b1 = params["b1"].reshape(-1, 1).astype(jnp.float32)
    b2 = params["b2"].reshape(-1, 1).astype(jnp.float32)
    b3 = params["b3"].reshape(-1, 1).astype(jnp.float32)
    b4 = params["b4"].reshape(-1, 1).astype(jnp.float32)

    def batch_spec(feat):
        # (features, tile) block; batch tile on the lane axis.
        return pl.BlockSpec((feat, tile), lambda i: (0, i))

    def full_spec(shape):
        # small resident weights / biases, constant block index.
        return pl.BlockSpec(shape, lambda i: (0, 0))

    # Advisory cost estimate so XLA schedules neighbours sensibly.
    n_mac = n_obs * n_hidden + 2 * n_hidden * n_hidden + n_hidden * n_out
    flops = 2 * b_pad * n_mac
    bytes_accessed = (
        b_pad * n_obs * 2                 # x stream (bf16, transposed)
        + b_pad * n_out * 4               # output stream (f32, transposed)
        + 2 * n_mac                       # weights (bf16)
        + 4 * (3 * n_hidden + n_out))     # biases (f32)
    cost = pl.CostEstimate(flops=flops, transcendentals=0,
                           bytes_accessed=bytes_accessed)

    out_t = pl.pallas_call(
        _mlp_kernel,
        out_shape=jax.ShapeDtypeStruct((n_out, b_pad), jnp.float32),
        grid_spec=pltpu.PrefetchScalarGridSpec(
            num_scalar_prefetch=0,
            grid=grid,
            in_specs=[
                batch_spec(n_obs),
                full_spec(w1.shape), full_spec(b1.shape),
                full_spec(w2.shape), full_spec(b2.shape),
                full_spec(w3.shape), full_spec(b3.shape),
                full_spec(w4.shape), full_spec(b4.shape),
            ],
            out_specs=batch_spec(n_out),
        ),
        compiler_params=pltpu.CompilerParams(
            dimension_semantics=("parallel",)),
        cost_estimate=cost,
    )(xt, w1, b1, w2, b2, w3, b3, w4, b4)

    # Back to the PyTorch (B, n_out) layout (n_out is tiny -> cheap pass).
    return out_t[:, :B].T


def init_params(key, n_obs, n_hidden, n_out):
    """Deterministic init matching PyTorch nn.Linear's U(-1/sqrt(fan_in), ...)."""
    dims = [(n_obs, n_hidden), (n_hidden, n_hidden),
            (n_hidden, n_hidden), (n_hidden, n_out)]
    params = {}
    keys = jax.random.split(key, 2 * len(dims))
    for li, (fan_in, fan_out) in enumerate(dims, start=1):
        bound = 1.0 / math.sqrt(fan_in)
        params[f"w{li}"] = jax.random.uniform(
            keys[2 * (li - 1)], (fan_in, fan_out), jnp.float32, -bound, bound)
        params[f"b{li}"] = jax.random.uniform(
            keys[2 * (li - 1) + 1], (1, fan_out), jnp.float32, -bound, bound)
    return params


def mlp_reference_f32(x, params):
    """Pure-f32 reference (what the PyTorch module computes)."""
    h = jnp.maximum(x @ params["w1"] + params["b1"], 0.0)
    h = jnp.maximum(h @ params["w2"] + params["b2"], 0.0)
    h = jnp.maximum(h @ params["w3"] + params["b3"], 0.0)
    return jnp.maximum(h @ params["w4"] + params["b4"], 0.0)


def mlp_reference_bf16(x, params):
    """Reference mirroring the kernel's bf16-input / f32-accumulate numerics."""
    hp = jax.lax.Precision.HIGHEST

    def lin(h, w, b):
        hb = h.astype(jnp.bfloat16).astype(jnp.float32)
        wb = w.astype(jnp.bfloat16).astype(jnp.float32)
        return jnp.maximum(jnp.dot(hb, wb, precision=hp) + b.astype(jnp.float32), 0.0)

    h = lin(x, params["w1"], params["b1"])
    h = lin(h, params["w2"], params["b2"])
    h = lin(h, params["w3"], params["b3"])
    return lin(h, params["w4"], params["b4"])


if __name__ == "__main__":
    n_obs_individual = 16   # n_obs_individual
    n_hidden = 32           # n_hidden
    n_output = 8            # n_output
    batch = 8               # small demo batch (padded to one 128-lane tile)

    key = jax.random.PRNGKey(0)
    kx, kp = jax.random.split(key)
    x = jax.random.normal(kx, (batch, n_obs_individual), jnp.float32)
    params = init_params(kp, n_obs_individual, n_hidden, n_output)

    out = mlp_forward(x, params)
    out = jax.block_until_ready(out)
    assert out.shape == (batch, n_output)

    # Tight check against a reference that uses the same bf16 input/weight casts.
    ref_bf16 = mlp_reference_bf16(x, params)
    assert jnp.allclose(out, ref_bf16, atol=1e-4, rtol=1e-4)

    # Loose sanity check against the full-f32 PyTorch-equivalent forward.
    ref_f32 = mlp_reference_f32(x, params)
    assert jnp.allclose(out, ref_f32, atol=1e-1, rtol=1e-1)

    print("KERNEL_OK")
</pallas_src>

<mosaic_0001>
module attributes {stable_mosaic.version = 11 : i64} {
  func.func @_mlp_kernel(%arg0: i32, %arg1: memref<16x128xbf16, #tpu.memory_space<vmem>>, %arg2: memref<32x16xbf16, #tpu.memory_space<vmem>>, %arg3: memref<32x1xf32, #tpu.memory_space<vmem>>, %arg4: memref<32x32xbf16, #tpu.memory_space<vmem>>, %arg5: memref<32x1xf32, #tpu.memory_space<vmem>>, %arg6: memref<32x32xbf16, #tpu.memory_space<vmem>>, %arg7: memref<32x1xf32, #tpu.memory_space<vmem>>, %arg8: memref<8x32xbf16, #tpu.memory_space<vmem>>, %arg9: memref<8x1xf32, #tpu.memory_space<vmem>>, %arg10: memref<8x128xf32, #tpu.memory_space<vmem>>) attributes {dimension_semantics = [#tpu.dimension_semantics<parallel>], iteration_bounds = array<i64: 1>, scalar_prefetch = 0 : i64, scratch_operands = 0 : i64, tpu.core_type = #tpu.core_type<tc>, window_params = [{transform_indices = @transform_0, window_bounds = array<i64: 16, 128>}, {pipeline_mode = #tpu.pipeline_mode<synchronous>, transform_indices = @transform_1, window_bounds = array<i64: 32, 16>}, {pipeline_mode = #tpu.pipeline_mode<synchronous>, transform_indices = @transform_2, window_bounds = array<i64: 32, 1>}, {pipeline_mode = #tpu.pipeline_mode<synchronous>, transform_indices = @transform_3, window_bounds = array<i64: 32, 32>}, {pipeline_mode = #tpu.pipeline_mode<synchronous>, transform_indices = @transform_4, window_bounds = array<i64: 32, 1>}, {pipeline_mode = #tpu.pipeline_mode<synchronous>, transform_indices = @transform_5, window_bounds = array<i64: 32, 32>}, {pipeline_mode = #tpu.pipeline_mode<synchronous>, transform_indices = @transform_6, window_bounds = array<i64: 32, 1>}, {pipeline_mode = #tpu.pipeline_mode<synchronous>, transform_indices = @transform_7, window_bounds = array<i64: 8, 32>}, {pipeline_mode = #tpu.pipeline_mode<synchronous>, transform_indices = @transform_8, window_bounds = array<i64: 8, 1>}, {transform_indices = @transform_9, window_bounds = array<i64: 8, 128>}]} {
    %c0 = arith.constant 0 : index
    %c0_0 = arith.constant 0 : index
    %0 = vector.load %arg2[%c0, %c0_0] : memref<32x16xbf16, #tpu.memory_space<vmem>>, vector<32x16xbf16>
    %c0_1 = arith.constant 0 : index
    %c0_2 = arith.constant 0 : index
    %1 = vector.load %arg1[%c0_1, %c0_2] : memref<16x128xbf16, #tpu.memory_space<vmem>>, vector<16x128xbf16>
    %cst = arith.constant dense<0.000000e+00> : vector<32x128xf32>
    %2 = tpu.matmul %0, %1, %cst {dimension_numbers = #tpu.dot_dimension_numbers<[1], [0], [0], [1], [0, 0, 1, 1], [], []>} : vector<32x16xbf16>, vector<16x128xbf16>, vector<32x128xf32> -> vector<32x128xf32>
    %c0_3 = arith.constant 0 : index
    %c0_4 = arith.constant 0 : index
    %3 = vector.load %arg3[%c0_3, %c0_4] : memref<32x1xf32, #tpu.memory_space<vmem>>, vector<32x1xf32>
    %4 = vector.broadcast %3 : vector<32x1xf32> to vector<32x128xf32>
    %5 = arith.addf %2, %4 : vector<32x128xf32>
    %cst_5 = arith.constant 0.000000e+00 : f32
    %6 = vector.broadcast %cst_5 : f32 to vector<32x128xf32>
    %7 = arith.maximumf %5, %6 : vector<32x128xf32>
    %c0_6 = arith.constant 0 : index
    %c0_7 = arith.constant 0 : index
    %8 = vector.load %arg4[%c0_6, %c0_7] : memref<32x32xbf16, #tpu.memory_space<vmem>>, vector<32x32xbf16>
    %9 = arith.truncf %7 : vector<32x128xf32> to vector<32x128xbf16>
    %cst_8 = arith.constant dense<0.000000e+00> : vector<32x128xf32>
    %10 = tpu.matmul %8, %9, %cst_8 {dimension_numbers = #tpu.dot_dimension_numbers<[1], [0], [0], [1], [0, 0, 1, 1], [], []>} : vector<32x32xbf16>, vector<32x128xbf16>, vector<32x128xf32> -> vector<32x128xf32>
    %c0_9 = arith.constant 0 : index
    %c0_10 = arith.constant 0 : index
    %11 = vector.load %arg5[%c0_9, %c0_10] : memref<32x1xf32, #tpu.memory_space<vmem>>, vector<32x1xf32>
    %12 = vector.broadcast %11 : vector<32x1xf32> to vector<32x128xf32>
    %13 = arith.addf %10, %12 : vector<32x128xf32>
    %cst_11 = arith.constant 0.000000e+00 : f32
    %14 = vector.broadcast %cst_11 : f32 to vector<32x128xf32>
    %15 = arith.maximumf %13, %14 : vector<32x128xf32>
    %c0_12 = arith.constant 0 : index
    %c0_13 = arith.constant 0 : index
    %16 = vector.load %arg6[%c0_12, %c0_13] : memref<32x32xbf16, #tpu.memory_space<vmem>>, vector<32x32xbf16>
    %17 = arith.truncf %15 : vector<32x128xf32> to vector<32x128xbf16>
    %cst_14 = arith.constant dense<0.000000e+00> : vector<32x128xf32>
    %18 = tpu.matmul %16, %17, %cst_14 {dimension_numbers = #tpu.dot_dimension_numbers<[1], [0], [0], [1], [0, 0, 1, 1], [], []>} : vector<32x32xbf16>, vector<32x128xbf16>, vector<32x128xf32> -> vector<32x128xf32>
    %c0_15 = arith.constant 0 : index
    %c0_16 = arith.constant 0 : index
    %19 = vector.load %arg7[%c0_15, %c0_16] : memref<32x1xf32, #tpu.memory_space<vmem>>, vector<32x1xf32>
    %20 = vector.broadcast %19 : vector<32x1xf32> to vector<32x128xf32>
    %21 = arith.addf %18, %20 : vector<32x128xf32>
    %cst_17 = arith.constant 0.000000e+00 : f32
    %22 = vector.broadcast %cst_17 : f32 to vector<32x128xf32>
    %23 = arith.maximumf %21, %22 : vector<32x128xf32>
    %c0_18 = arith.constant 0 : index
    %c0_19 = arith.constant 0 : index
    %24 = vector.load %arg8[%c0_18, %c0_19] : memref<8x32xbf16, #tpu.memory_space<vmem>>, vector<8x32xbf16>
    %25 = arith.truncf %23 : vector<32x128xf32> to vector<32x128xbf16>
    %cst_20 = arith.constant dense<0.000000e+00> : vector<8x128xf32>
    %26 = tpu.matmul %24, %25, %cst_20 {dimension_numbers = #tpu.dot_dimension_numbers<[1], [0], [0], [1], [0, 0, 1, 1], [], []>} : vector<8x32xbf16>, vector<32x128xbf16>, vector<8x128xf32> -> vector<8x128xf32>
    %c0_21 = arith.constant 0 : index
    %c0_22 = arith.constant 0 : index
    %27 = vector.load %arg9[%c0_21, %c0_22] : memref<8x1xf32, #tpu.memory_space<vmem>>, vector<8x1xf32>
    %28 = vector.broadcast %27 : vector<8x1xf32> to vector<8x128xf32>
    %29 = arith.addf %26, %28 : vector<8x128xf32>
    %cst_23 = arith.constant 0.000000e+00 : f32
    %30 = vector.broadcast %cst_23 : f32 to vector<8x128xf32>
    %31 = arith.maximumf %29, %30 : vector<8x128xf32>
    %c0_24 = arith.constant 0 : index
    %c0_25 = arith.constant 0 : index
    %32 = vector.load %arg10[%c0_24, %c0_25] : memref<8x128xf32, #tpu.memory_space<vmem>>, vector<8x128xf32>
    tpu.vector_store %arg10[%c0_24, %c0_25], %31 {strides = array<i32>} : memref<8x128xf32, #tpu.memory_space<vmem>>, vector<8x128xf32>,
    return
  }
  func.func @transform_0(%arg0: i32) -> (i32, i32) {
    %c0_i32 = arith.constant 0 : i32
    %c0_i32_0 = arith.constant 0 : i32
    return %c0_i32, %arg0 : i32, i32
  }
  func.func @transform_1(%arg0: i32) -> (i32, i32) {
    %c0_i32 = arith.constant 0 : i32
    %c0_i32_0 = arith.constant 0 : i32
    %c0_i32_1 = arith.constant 0 : i32
    return %c0_i32, %c0_i32_0 : i32, i32
  }
  func.func @transform_2(%arg0: i32) -> (i32, i32) {
    %c0_i32 = arith.constant 0 : i32
    %c0_i32_0 = arith.constant 0 : i32
    %c0_i32_1 = arith.constant 0 : i32
    return %c0_i32, %c0_i32_0 : i32, i32
  }
  func.func @transform_3(%arg0: i32) -> (i32, i32) {
    %c0_i32 = arith.constant 0 : i32
    %c0_i32_0 = arith.constant 0 : i32
    %c0_i32_1 = arith.constant 0 : i32
    return %c0_i32, %c0_i32_0 : i32, i32
  }
  func.func @transform_4(%arg0: i32) -> (i32, i32) {
    %c0_i32 = arith.constant 0 : i32
    %c0_i32_0 = arith.constant 0 : i32
    %c0_i32_1 = arith.constant 0 : i32
    return %c0_i32, %c0_i32_0 : i32, i32
  }
  func.func @transform_5(%arg0: i32) -> (i32, i32) {
    %c0_i32 = arith.constant 0 : i32
    %c0_i32_0 = arith.constant 0 : i32
    %c0_i32_1 = arith.constant 0 : i32
    return %c0_i32, %c0_i32_0 : i32, i32
  }
  func.func @transform_6(%arg0: i32) -> (i32, i32) {
    %c0_i32 = arith.constant 0 : i32
    %c0_i32_0 = arith.constant 0 : i32
    %c0_i32_1 = arith.constant 0 : i32
    return %c0_i32, %c0_i32_0 : i32, i32
  }
  func.func @transform_7(%arg0: i32) -> (i32, i32) {
    %c0_i32 = arith.constant 0 : i32
    %c0_i32_0 = arith.constant 0 : i32
    %c0_i32_1 = arith.constant 0 : i32
    return %c0_i32, %c0_i32_0 : i32, i32
  }
  func.func @transform_8(%arg0: i32) -> (i32, i32) {
    %c0_i32 = arith.constant 0 : i32
    %c0_i32_0 = arith.constant 0 : i32
    %c0_i32_1 = arith.constant 0 : i32
    return %c0_i32, %c0_i32_0 : i32, i32
  }
  func.func @transform_9(%arg0: i32) -> (i32, i32) {
    %c0_i32 = arith.constant 0 : i32
    %c0_i32_0 = arith.constant 0 : i32
    return %c0_i32, %arg0 : i32, i32
  }
}

</mosaic_0001>

<bundles_post_ra>
// kernel: tpu_custom_call.1
= control target key start
LH: loop header
LB: loop body
LE: loop exit
PB: predicated region body
PF: predicated region fallthrough
CT: control target
= control target key end

     0   :  { %v365_v2 = vmov 0   ;;  %vm80_vm0 = vcmask 130048   ;;  %s488_s0 = inlined_call_operand.vmem [shape: bf16[16,128], index: 0, kind: input, shape index: {}]   ;;  %s489_s1 = inlined_call_operand.vmem [shape: bf16[32,16], index: 1, kind: input, shape index: {}]   ;;  %s490_s2 = inlined_call_operand.vmem [shape: f32[32,1], index: 2, kind: input, shape index: {}]   ;;  %s491_s3 = inlined_call_operand.vmem [shape: bf16[32,32], index: 3, kind: input, shape index: {}]   ;;  %s492_s4 = inlined_call_operand.vmem [shape: f32[32,1], index: 4, kind: input, shape index: {}]   ;;  %s493_s5 = inlined_call_operand.vmem [shape: bf16[32,32], index: 5, kind: input, shape index: {}]   ;;  %s494_s6 = inlined_call_operand.vmem [shape: f32[32,1], index: 6, kind: input, shape index: {}]   ;;  %s495_s7 = inlined_call_operand.vmem [shape: bf16[8,32], index: 7, kind: input, shape index: {}]   ;;  %s496_s8 = inlined_call_operand.vmem [shape: f32[8,1], index: 8, kind: input, shape index: {}]   ;;  %s497_s9 = inlined_call_operand.hbm [shape: f32[8,128], index: 9, kind: output, shape index: {}]  }
   0x1   :  { %v42_v0 = vld [vmem:[%s490_s2 + $0x10] sm:$0xff]  ;;  %v329_v1 = vld [vmem:[%s488_s0] sm:$0xff]  ;;  %336 = vset.pattern.permute.xlu0 %v365_v2  ;;  %337 = vset.pattern.permute.xlu1 %v365_v2 }
   0x2   :  { %v327_v3 = vld [vmem:[%s489_s1] sm:$0xff]  ;;  %56 = vperm.xlu0 %336, %v42_v0   ;;  %94 = vmatpush.bf16.msra.mxu0 %v329_v1 }
   0x3   :  { %v40_v4 = vld [vmem:[%s490_s2] sm:$0xff]  ;;  %338 = vset.pattern.permute.xlu2 %v365_v2 }
   0x4   :  { %46 = vperm.xlu1 %337, %v40_v4  }
   0x5   :  { %14 = vsyncpa [#allocation3], 0  ;;  %304 = vmatmul.msk.bf16.vlgmr.msra.gmra.mxu0 %vm80_vm0, %v327_v3  ;;  %v43_v5 = vld [vmem:[%s490_s2 + $0x18] sm:$0xff]  ;;  %v41_v6 = vld [vmem:[%s490_s2 + $0x8] sm:$0xff]  ;;  %vm150_vm1 = vcmask 261120   ;;  %s366_s21 = smov [#allocation2]  }
   0x6   :  { %v116_v7 = vld [vmem:[%s492_s4] sm:$0xff]  ;;  %v117_v8 = vld [vmem:[%s492_s4 + $0x8] sm:$0xff]  ;;  %v189_v10 = vld [vmem:[%s494_s6 + $0x18] sm:$0xff]  ;;  %s281_s22 = sshll.u32 %s366_s21, 4  ;;  %s283_s25 = sshll.u32 %s497_s9, 4  ;;  %s282_s22 = int_to_ptr.vmem [resolvable:$true] %s281_s22  ;;  %s284_s25 = int_to_ptr.hbm [resolvable:$true] %s283_s25 }
   0x7   :  { %v328_v9 = vld [vmem:[%s489_s1 + $0x8] sm:$0xff]  ;;  %v186_v11 = vld [vmem:[%s494_s6] sm:$0xff]  ;;  %v118_v18 = vld [vmem:[%s492_s4 + $0x10] sm:$0xff] }
   0x8   :  { %v252_v12 = vld [vmem:[%s496_s8] sm:$0xff]  ;;  %132 = vperm.xlu2 %338, %v118_v18   ;;  %v119_v28 = vld [vmem:[%s492_s4 + $0x18] sm:$0xff]  ;;  %v188_v34 = vld [vmem:[%s494_s6 + $0x10] sm:$0xff] }
   0x9   :  { %v330_v33 = vld [vmem:[%s491_s3] sm:$0xff]  ;;  %v187_v35 = vld [vmem:[%s494_s6 + $0x8] sm:$0xff] }
   0xa   :  { %61 = vperm.xlu0 %336, %v43_v5   ;;  %v331_v36 = vld [vmem:[%s491_s3 + $0x8] sm:$0xff]  ;;  %v332_v55 = vld [vmem:[%s493_s5] sm:$0xff] }
   0xb   :  { %v333_v56 = vld [vmem:[%s493_s5 + $0x8] sm:$0xff] }
   0xc   :  { %51 = vperm.xlu1 %337, %v41_v6  }
  0x10   :  { %137 = vperm.xlu2 %338, %v119_v28  }
  0x12   :  { %122 = vperm.xlu0 %336, %v116_v7  }
  0x14   :  { %127 = vperm.xlu1 %337, %v117_v8  }
  0x15   :  { %305 = vmatmul.msk.bf16.gmra.mxu0 %vm80_vm0, %v328_v9 }
  0x18   :  { %202 = vperm.xlu2 %338, %v188_v34  }
  0x1a   :  { %207 = vperm.xlu0 %336, %v189_v10  }
  0x1c   :  { %192 = vperm.xlu1 %337, %v186_v11   ;;  %v249_v11 = vld [vmem:[%s495_s7] sm:$0xf] }
  0x20   :  { %197 = vperm.xlu2 %338, %v187_v35  }
  0x22   :  { %255 = vperm.xlu0 %336, %v252_v12  }
  0x62   :  { %v133_v39 = vpop.permute.xlu2 %132 }
  0x6a   :  { %v138_v43 = vpop.permute.xlu2 %137 }
  0x72   :  { %v203_v59 = vpop.permute.xlu2 %202 }
  0x74   :  { %v57_v15 = vpop.permute.xlu0 %56 }
  0x76   :  { %v47_v16 = vpop.permute.xlu1 %46 }
  0x7a   :  { %v198_v63 = vpop.permute.xlu2 %197 }
  0x7c   :  { %v62_v19 = vpop.permute.xlu0 %61 }
  0x7e   :  { %v52_v21 = vpop.permute.xlu1 %51 }
  0x82   :  { %v96_v13 = vpop.f32.mrf.mxu0 }
  0x83   :  { %v97_v25 = vadd.f32 %v96_v13, %v47_v16 }
  0x84   :  { %v123_v47 = vpop.permute.xlu0 %122 }
  0x85   :  { %v106_v31 = vmax.f32 %v97_v25, 0.0 }
  0x86   :  { %v128_v41 = vpop.permute.xlu1 %127 }
  0x8a   :  { %v98_v14 = vpop.f32.mrf.mxu0 }
  0x8b   :  { %v99_v23 = vadd.f32 %v98_v14, %v52_v21 }
  0x8c   :  { %v208_v61 = vpop.permute.xlu0 %207 }
  0x8d   :  { %v107_v29 = vmax.f32 %v99_v23, 0.0 }
  0x8e   :  { %v193_v3 = vpop.permute.xlu1 %192 }
  0x8f   :  { %v114_v32 = vpack.c.bf16 %v107_v29, %v106_v31 }
  0x92   :  { %v101_v17 = vpop.f32.mrf.mxu0 }
  0x93   :  { %v102_v20 = vadd.f32 %v101_v17, %v57_v15 }
  0x94   :  { %v256_v12 = vpop.permute.xlu0 %255 }
  0x95   :  { %v108_v26 = vmax.f32 %v102_v20, 0.0 }
  0x9a   :  { %v103_v22 = vpop.f32.mrf.mxu0 }
  0x9b   :  { %v104_v24 = vadd.f32 %v103_v22, %v62_v19 }
  0x9d   :  { %v109_v27 = vmax.f32 %v104_v24, 0.0 }
  0x9f   :  { %v115_v30 = vpack.c.bf16 %v109_v27, %v108_v26 }
  0xa1   :  { %163 = vmatpush.bf16.msra.mxu1 %v115_v30 }
  0xa5   :  { %164 = vmatpush.bf16.msra.mxu1 %v114_v32 }
  0xa8   :  { %314 = vmatmul.msk.bf16.vlgmr.msra.gmra.mxu1 %vm150_vm1, %v330_v33 }
  0xb8   :  { %315 = vmatmul.msk.bf16.gmra.mxu1 %vm150_vm1, %v331_v36 }
 0x125   :  { %v166_v37 = vpop.f32.mrf.mxu1 }
 0x126   :  { %v167_v48 = vadd.f32 %v166_v37, %v123_v47 }
 0x128   :  { %v176_v53 = vmax.f32 %v167_v48, 0.0 }
 0x12d   :  { %v168_v38 = vpop.f32.mrf.mxu1 }
 0x12e   :  { %v169_v45 = vadd.f32 %v168_v38, %v128_v41 }
 0x130   :  { %v177_v51 = vmax.f32 %v169_v45, 0.0 }
 0x132   :  { %v184_v54 = vpack.c.bf16 %v177_v51, %v176_v53 }
 0x135   :  { %v171_v40 = vpop.f32.mrf.mxu1 }
 0x136   :  { %v172_v42 = vadd.f32 %v171_v40, %v133_v39 }
 0x138   :  { %v178_v49 = vmax.f32 %v172_v42, 0.0 }
 0x13d   :  { %v173_v44 = vpop.f32.mrf.mxu1 }
 0x13e   :  { %v174_v46 = vadd.f32 %v173_v44, %v138_v43 }
 0x140   :  { %v179_v50 = vmax.f32 %v174_v46, 0.0 }
 0x142   :  { %v185_v52 = vpack.c.bf16 %v179_v50, %v178_v49 }
 0x144   :  { %232 = vmatpush.bf16.msra.mxu2 %v185_v52 }
 0x148   :  { %233 = vmatpush.bf16.msra.mxu2 %v184_v54 }
 0x14b   :  { %324 = vmatmul.msk.bf16.vlgmr.msra.gmra.mxu2 %vm150_vm1, %v332_v55 }
 0x15b   :  { %325 = vmatmul.msk.bf16.gmra.mxu2 %vm150_vm1, %v333_v56 }
 0x1ce   :  { %v235_v57 = vpop.f32.mrf.mxu2 }
 0x1cf   :  { %v236_v4 = vadd.f32 %v235_v57, %v193_v3 }
 0x1d1   :  { %v245_v9 = vmax.f32 %v236_v4, 0.0 }
 0x1d6   :  { %v237_v58 = vpop.f32.mrf.mxu2 }
 0x1d7   :  { %v238_v1 = vadd.f32 %v237_v58, %v198_v63 }
 0x1d9   :  { %v246_v7 = vmax.f32 %v238_v1, 0.0 }
 0x1db   :  { %v250_v10 = vpack.c.bf16 %v246_v7, %v245_v9 }
 0x1de   :  { %v240_v60 = vpop.f32.mrf.mxu2 }
 0x1df   :  { %v241_v62 = vadd.f32 %v240_v60, %v203_v59 }
 0x1e1   :  { %v247_v5 = vmax.f32 %v241_v62, 0.0 }
 0x1e6   :  { %v242_v0 = vpop.f32.mrf.mxu2 }
 0x1e7   :  { %v243_v2 = vadd.f32 %v242_v0, %v208_v61 }
 0x1e9   :  { %v248_v6 = vmax.f32 %v243_v2, 0.0 }
 0x1eb   :  { %v251_v8 = vpack.c.bf16 %v248_v6, %v247_v5 }
 0x1ed   :  { %267 = vmatpush.bf16.msra.mxu3 %v251_v8 }
 0x1f1   :  { %268 = vmatpush.bf16.msra.mxu3 %v250_v10 }
 0x1f4   :  { %326 = vmatmul.msk.bf16.vlgmr.msra.gmra.mxu3 %vm150_vm1, %v249_v11 }
 0x277   :  { %v270_v13 = vpop.f32.mrf.mxu3 }
 0x278   :  { %v271_v14 = vadd.f32 %v270_v13, %v256_v12 }
 0x27a   :  { %v274_v15 = vmax.f32 %v271_v14, 0.0 }
 0x27c   :  { %275 = vst [vmem:[#allocation2] sm:$0xff] %v274_v15 }
 0x27d   :  { %286 = dma.vmem_to_hbm [thread:$0]  %s282_s22, 128, %s284_s25, [#allocation3]  }
 0x27f   :  { %v272_v16 = vpop.f32.mrf.mxu3 }
 0x280   :  { %363 = dma.done.wait [#allocation3], 128  }
 0x281   :  { %364 = vsyncadd [#allocation3], 4294967168 }
 0x282   :  { %291 = vsyncpa [#allocation3], 1 }

</bundles_post_ra>
